<compile_context>
chip_gen: v7x
topology: tpu7x:2x2x1
jax: 0.10.0
libtpu: 0.0.40
codegen_flags: <defaults>
</compile_context>

<pallas_src>
import functools

import jax
import jax.numpy as jnp
from jax.experimental import pallas as pl
from jax.experimental.pallas import tpu as pltpu

_BN_EPS = 1e-5
_LANE = 128

# Compatibility shim: CompilerParams was named TPUCompilerParams in older JAX.
_CompilerParams = getattr(pltpu, "CompilerParams", None) or getattr(
    pltpu, "TPUCompilerParams", None
)


def _round_up(x, m):
    return (x + m - 1) // m * m


def _vmem_capacity_bytes():
    try:
        info = pltpu.get_tpu_info()
        for attr in ("vmem_capacity_bytes", "vmem_size_bytes", "vmem_bytes"):
            v = getattr(info, attr, None)
            if v:
                return int(v)
    except Exception:
        pass
    return 64 * 1024 * 1024  # conservative: v7x per-TensorCore VMEM


def _pick_tiles(n):
    """Generation-aware (row, source) tiles for the graph-conv grid."""
    vmem = _vmem_capacity_bytes()
    if vmem >= 96 * 1024 * 1024:  # v5e / v6e: 128 MiB physical VMEM
        t_row_max, t_k_max, vmem_limit = 2048, 4096, 100 * 1024 * 1024
    else:                         # v7x: 64 MiB physical VMEM per core
        t_row_max, t_k_max, vmem_limit = 1024, 2048, 48 * 1024 * 1024

    n128 = _round_up(max(n, 1), _LANE)
    t_row = min(t_row_max, n128)
    n_pad = _round_up(n, t_row)
    # Largest multiple of t_row that is <= t_k_max and divides n_pad, so one
    # padded node count serves both grid axes without extra padding waste.
    t_k = t_row
    for mult in range(max(t_k_max // t_row, 1), 0, -1):
        if n_pad % (mult * t_row) == 0:
            t_k = mult * t_row
            break
    return t_row, t_k, n_pad, vmem_limit


def _compiler_params(semantics, vmem_limit):
    if _CompilerParams is None:
        return None
    return _CompilerParams(dimension_semantics=semantics,
                           vmem_limit_bytes=vmem_limit)


# ---------------------------------------------------------------------------
# Kernel 1: input projection  relu(x @ W0' + b0')   (BN0 folded into W0', b0')
#   grid = (row tiles i, K tiles k); f32 accumulator lives in the f32 output.
#   Emits both f32 (residual stream) and bf16 (source stream) copies.
# ---------------------------------------------------------------------------
def _fc_relu_kernel(x_ref, w_ref, b_ref, of_ref, ob_ref):
    k = pl.program_id(1)

    @pl.when(k == 0)
    def _init():
        of_ref[...] = jnp.zeros_like(of_ref)

    of_ref[...] += jnp.dot(
        x_ref[...].astype(jnp.bfloat16),
        w_ref[...],
        preferred_element_type=jnp.float32,
    )

    @pl.when(k == pl.num_programs(1) - 1)
    def _finalize():
        h = jnp.maximum(of_ref[...] + b_ref[...], 0.0)
        # TODO(synk): dropout(p=0.5) is identity in eval mode; training-mode
        # stochastic dropout is not implemented here.
        of_ref[...] = h
        ob_ref[...] = h.astype(jnp.bfloat16)


def fc_relu(x, w, b, *, t_row, vmem_limit):
    n_pad, c_pad = x.shape
    h_pad = w.shape[1]
    t_kc = min(c_pad, 512)
    while c_pad % t_kc:
        t_kc -= _LANE
    return pl.pallas_call(
        _fc_relu_kernel,
        out_shape=(jax.ShapeDtypeStruct((n_pad, h_pad), jnp.float32),
                   jax.ShapeDtypeStruct((n_pad, h_pad), jnp.bfloat16)),
        grid=(n_pad // t_row, c_pad // t_kc),
        in_specs=[
            pl.BlockSpec((t_row, t_kc), lambda i, k: (i, k)),
            pl.BlockSpec((t_kc, h_pad), lambda i, k: (k, 0)),
            pl.BlockSpec((1, h_pad), lambda i, k: (0, 0)),
        ],
        out_specs=(pl.BlockSpec((t_row, h_pad), lambda i, k: (i, 0)),
                   pl.BlockSpec((t_row, h_pad), lambda i, k: (i, 0))),
        compiler_params=_compiler_params(("parallel", "arbitrary"), vmem_limit),
    )(x, w, b)


# ---------------------------------------------------------------------------
# Kernel 2: one GraphConvLayer + (folded) BN + ReLU + residual, tiled.
#   grid = (row tiles i, source-node tiles k), t_k >> t_row allowed:
#     out_f32[i]  += A[i,k] @ x_bf16[k]                 (bf16 MXU, f32 accumulate)
#     at k==last:  h = relu(out_f32[i] @ Wc' + bc') + x_f32[i]
#                  out_f32[i] = h ; out_bf16[i] = bf16(h)
# ---------------------------------------------------------------------------
def _graph_conv_kernel(adj_ref, xsrc_ref, xres_ref, w_ref, b_ref, of_ref, ob_ref):
    k = pl.program_id(1)

    @pl.when(k == 0)
    def _init():
        of_ref[...] = jnp.zeros_like(of_ref)

    of_ref[...] += jnp.dot(
        adj_ref[...],
        xsrc_ref[...],
        preferred_element_type=jnp.float32,
    )

    @pl.when(k == pl.num_programs(1) - 1)
    def _finalize():
        h = jnp.dot(
            of_ref[...].astype(jnp.bfloat16),
            w_ref[...],
            preferred_element_type=jnp.float32,
        ) + b_ref[...]
        h = jnp.maximum(h, 0.0)            # BN folded into (Wc', bc'); activation
        # TODO(synk): dropout(p=0.5) is identity in eval mode.
        h = h + xres_ref[...]              # residual with the layer input (f32)
        of_ref[...] = h
        ob_ref[...] = h.astype(jnp.bfloat16)


def graph_conv_layer(adj, x_src_bf16, x_res_f32, w, b, *, t_row, t_k, vmem_limit):
    n_pad, h_pad = x_res_f32.shape
    return pl.pallas_call(
        _graph_conv_kernel,
        out_shape=(jax.ShapeDtypeStruct((n_pad, h_pad), jnp.float32),
                   jax.ShapeDtypeStruct((n_pad, h_pad), jnp.bfloat16)),
        grid=(n_pad // t_row, n_pad // t_k),
        in_specs=[
            pl.BlockSpec((t_row, t_k), lambda i, k: (i, k)),     # adj tile (bf16)
            pl.BlockSpec((t_k, h_pad), lambda i, k: (k, 0)),     # source rows (bf16)
            pl.BlockSpec((t_row, h_pad), lambda i, k: (i, 0)),   # residual rows (f32)
            pl.BlockSpec((h_pad, h_pad), lambda i, k: (0, 0)),   # Wc (BN folded, bf16)
            pl.BlockSpec((1, h_pad), lambda i, k: (0, 0)),       # bc (BN folded, f32)
        ],
        out_specs=(pl.BlockSpec((t_row, h_pad), lambda i, k: (i, 0)),
                   pl.BlockSpec((t_row, h_pad), lambda i, k: (i, 0))),
        compiler_params=_compiler_params(("parallel", "arbitrary"), vmem_limit),
    )(adj, x_src_bf16, x_res_f32, w, b)


# ---------------------------------------------------------------------------
# JAX glue: degree-normalized dense adjacency (the SparseTensor + matmul path)
# ---------------------------------------------------------------------------
def build_normalized_adj(edge_index, edge_weight, n, n_pad):
    row, col = edge_index[0], edge_index[1]
    d = jnp.zeros((n,), jnp.float32).at[col].add(1.0)        # degree(col, N)
    d_norm_in = jnp.sqrt(1.0 / d[col])
    d_norm_out = jnp.sqrt(1.0 / d[row])
    value = edge_weight * d_norm_in * d_norm_out
    value = jnp.nan_to_num(value, nan=0.0, posinf=0.0, neginf=0.0)
    # SparseTensor(row=col, col=row, value): out[i] = sum_{e: col[e]==i} value[e]*x[row[e]]
    adj = jnp.zeros((n_pad, n_pad), jnp.float32).at[col, row].add(value)
    # TODO(synk): for E << N^2 a zero-tile-skipping path (PrefetchScalarGridSpec with a
    # per-row-stripe nonzero-tile table) or full CSR gather would cut traffic from
    # O(N^2) to ~O(E*H); dense-tiled bf16 is used here.
    return adj.astype(jnp.bfloat16)


# ---------------------------------------------------------------------------
# Host-side parameter preparation: fold eval-mode BN, pad to lane-dense shapes,
# cast weights to bf16. Done once.
# ---------------------------------------------------------------------------
def prepare_params(params, in_channels, hidden_channels):
    c_pad = _round_up(in_channels, _LANE)
    h_pad = _round_up(hidden_channels, _LANE)

    def fold(lin, bn, fan_in, fan_in_pad):
        scale = bn["gamma"] * jax.lax.rsqrt(bn["var"] + _BN_EPS)
        w = lin["w"] * scale[None, :]
        b = (lin["b"] - bn["mean"]) * scale + bn["beta"]
        w_p = (
            jnp.zeros((fan_in_pad, h_pad), jnp.float32)
            .at[:fan_in, :hidden_channels]
            .set(w)
        )
        b_p = jnp.zeros((1, h_pad), jnp.float32).at[0, :hidden_channels].set(b)
        return w_p.astype(jnp.bfloat16), b_p

    return {
        "in_channels": in_channels,
        "hidden": hidden_channels,
        "c_pad": c_pad,
        "h_pad": h_pad,
        "fc0": fold(params["fc0"], params["bn0"], in_channels, c_pad),
        "convs": [
            fold(cp, bn, hidden_channels, h_pad)
            for cp, bn in zip(params["convs"], params["bns"])
        ],
    }


# ---------------------------------------------------------------------------
# Full GraphConv forward
# ---------------------------------------------------------------------------
def graph_conv_forward(prepped, x, edge_index, edge_weight):
    n, c = x.shape
    t_row, t_k, n_pad, vmem_limit = _pick_tiles(n)

    # TODO(synk): for static graphs the dense normalized adjacency should be built
    # once and cached across calls instead of re-scattered every forward.
    adj = build_normalized_adj(edge_index, edge_weight, n, n_pad)
    x_p = jnp.zeros((n_pad, prepped["c_pad"]), jnp.float32).at[:n, :c].set(x)

    # fcs[0] + bns[0] + relu (+ dropout = identity in eval mode)
    w0, b0 = prepped["fc0"]
    h_f32, h_bf16 = fc_relu(x_p, w0, b0, t_row=t_row, vmem_limit=vmem_limit)

    # conv layers (residual with the previous layer output == the layer input)
    for w, b in prepped["convs"]:
        h_f32, h_bf16 = graph_conv_layer(
            adj, h_bf16, h_f32, w, b, t_row=t_row, t_k=t_k, vmem_limit=vmem_limit
        )

    return h_f32[:n, : prepped["hidden"]]


# Pure-JAX reference (same BN-folded params, f32 math) for validation.
def reference_forward(prepped, x, edge_index, edge_weight):
    n, c = x.shape
    n_pad = _round_up(n, _LANE)
    adj = build_normalized_adj(edge_index, edge_weight, n, n_pad).astype(jnp.float32)
    x_p = jnp.zeros((n_pad, prepped["c_pad"]), jnp.float32).at[:n, :c].set(x)
    w0, b0 = prepped["fc0"]
    h = jnp.maximum(x_p @ w0.astype(jnp.float32) + b0, 0.0)
    for w, b in prepped["convs"]:
        agg = adj @ h
        h = jnp.maximum(agg @ w.astype(jnp.float32) + b, 0.0) + h
    return h[:n, : prepped["hidden"]]


def init_params(key, in_channels, hidden_channels, num_layers):
    def linear(k, fan_in, fan_out):
        kw, kb = jax.random.split(k)
        bound = 1.0 / jnp.sqrt(fan_in)
        w = jax.random.uniform(kw, (fan_in, fan_out), jnp.float32, -bound, bound)
        b = jax.random.uniform(kb, (fan_out,), jnp.float32, -bound, bound)
        return {"w": w, "b": b}

    def bn(k, c):
        kg, kb = jax.random.split(k)
        return {
            "gamma": 1.0 + 0.1 * jax.random.normal(kg, (c,), jnp.float32),
            "beta": 0.1 * jax.random.normal(kb, (c,), jnp.float32),
            "mean": jnp.zeros((c,), jnp.float32),  # eval-mode running stats
            "var": jnp.ones((c,), jnp.float32),
        }

    keys = jax.random.split(key, 2 + 2 * num_layers)
    return {
        "fc0": linear(keys[0], in_channels, hidden_channels),
        "bn0": bn(keys[1], hidden_channels),
        "convs": [
            linear(keys[2 + 2 * i], hidden_channels, hidden_channels)
            for i in range(num_layers)
        ],
        "bns": [bn(keys[3 + 2 * i], hidden_channels) for i in range(num_layers)],
    }


if __name__ == "__main__":
    N = 64        # number of graph nodes
    IN_CH = 16    # input feature channels
    HIDDEN = 32   # hidden channels
    NUM_LAYERS = 2
    E = 256       # number of edges

    key = jax.random.PRNGKey(0)
    kx, ke, kw, kp = jax.random.split(key, 4)

    x = jax.random.normal(kx, (N, IN_CH), jnp.float32)
    edge_index = jax.random.randint(ke, (2, E), 0, N, dtype=jnp.int32)
    edge_weight = jax.random.uniform(kw, (E,), jnp.float32, 0.5, 1.5)

    params = init_params(kp, IN_CH, HIDDEN, NUM_LAYERS)
    prepped = prepare_params(params, IN_CH, HIDDEN)

    fwd = jax.jit(functools.partial(graph_conv_forward, prepped))
    out = jax.block_until_ready(fwd(x, edge_index, edge_weight))

    ref = jax.block_until_ready(reference_forward(prepped, x, edge_index, edge_weight))

    assert out.shape == (N, HIDDEN) and out.dtype == jnp.float32
    assert bool(jnp.all(jnp.isfinite(out)))
    assert bool(jnp.allclose(out, ref, rtol=1e-1, atol=1e-1)), float(
        jnp.max(jnp.abs(out - ref))
    )
    print("KERNEL_OK")
</pallas_src>

<mosaic_0001>
module attributes {stable_mosaic.version = 11 : i64} {
  func.func private @main(%arg0: i32) attributes {dimension_semantics = [#tpu.dimension_semantics<core_parallel>], iteration_bounds = array<i64: 2>, tpu.core_type = #tpu.core_type<sc_scalar_subcore>, window_params = []} {
    return
  }
}

module attributes {stable_mosaic.version = 11 : i64} {
  func.func private @main(%arg0: i32) attributes {dimension_semantics = [#tpu.dimension_semantics<core_parallel>], iteration_bounds = array<i64: 2>, tpu.core_type = #tpu.core_type<sc_scalar_subcore>, window_params = []} {
    return
  }
}

module attributes {stable_mosaic.version = 11 : i64} {
  func.func @_fc_relu_kernel(%arg0: i32, %arg1: i32, %arg2: memref<128x128xf32, #tpu.memory_space<vmem>>, %arg3: memref<128x128xbf16, #tpu.memory_space<vmem>>, %arg4: memref<1x128xf32, #tpu.memory_space<vmem>>, %arg5: memref<128x128xf32, #tpu.memory_space<vmem>>, %arg6: memref<128x128xbf16, #tpu.memory_space<vmem>>) attributes {dimension_semantics = [#tpu.dimension_semantics<parallel>, #tpu.dimension_semantics<arbitrary>], iteration_bounds = array<i64: 1, 1>, scalar_prefetch = 0 : i64, scratch_operands = 0 : i64, tpu.core_type = #tpu.core_type<tc>, window_params = [{transform_indices = @transform_0, window_bounds = array<i64: 128, 128>}, {transform_indices = @transform_1, window_bounds = array<i64: 128, 128>}, {pipeline_mode = #tpu.pipeline_mode<synchronous>, transform_indices = @transform_2, window_bounds = array<i64: 1, 128>}, {transform_indices = @transform_3, window_bounds = array<i64: 128, 128>}, {transform_indices = @transform_4, window_bounds = array<i64: 128, 128>}]} {
    %c0_i32 = arith.constant 0 : i32
    %0 = arith.cmpi eq, %arg1, %c0_i32 : i32
    %1 = arith.extui %0 : i1 to i32
    %c0_i32_0 = arith.constant 0 : i32
    %2 = arith.cmpi ne, %1, %c0_i32_0 : i32
    scf.if %2 {
      %cst_10 = arith.constant 0.000000e+00 : f32
      %13 = vector.broadcast %cst_10 : f32 to vector<128x128xf32>
      %c0_11 = arith.constant 0 : index
      %c0_12 = arith.constant 0 : index
      %14 = vector.load %arg5[%c0_11, %c0_12] : memref<128x128xf32, #tpu.memory_space<vmem>>, vector<128x128xf32>
      tpu.vector_store %arg5[%c0_11, %c0_12], %13 {strides = array<i32>} : memref<128x128xf32, #tpu.memory_space<vmem>>, vector<128x128xf32>,
    } else {
    }
    %c0 = arith.constant 0 : index
    %c0_1 = arith.constant 0 : index
    %3 = vector.load %arg5[%c0, %c0_1] : memref<128x128xf32, #tpu.memory_space<vmem>>, vector<128x128xf32>
    %c0_2 = arith.constant 0 : index
    %c0_3 = arith.constant 0 : index
    %4 = vector.load %arg2[%c0_2, %c0_3] : memref<128x128xf32, #tpu.memory_space<vmem>>, vector<128x128xf32>
    %5 = arith.truncf %4 : vector<128x128xf32> to vector<128x128xbf16>
    %c0_4 = arith.constant 0 : index
    %c0_5 = arith.constant 0 : index
    %6 = vector.load %arg3[%c0_4, %c0_5] : memref<128x128xbf16, #tpu.memory_space<vmem>>, vector<128x128xbf16>
    %cst = arith.constant dense<0.000000e+00> : vector<128x128xf32>
    %7 = tpu.matmul %5, %6, %cst {dimension_numbers = #tpu.dot_dimension_numbers<[1], [0], [0], [1], [0, 0, 1, 1], [], []>} : vector<128x128xbf16>, vector<128x128xbf16>, vector<128x128xf32> -> vector<128x128xf32>
    %8 = arith.addf %3, %7 : vector<128x128xf32>
    %c0_6 = arith.constant 0 : index
    %c0_7 = arith.constant 0 : index
    %9 = vector.load %arg5[%c0_6, %c0_7] : memref<128x128xf32, #tpu.memory_space<vmem>>, vector<128x128xf32>
    tpu.vector_store %arg5[%c0_6, %c0_7], %8 {strides = array<i32>} : memref<128x128xf32, #tpu.memory_space<vmem>>, vector<128x128xf32>,
    %c0_i32_8 = arith.constant 0 : i32
    %10 = arith.cmpi eq, %arg1, %c0_i32_8 : i32
    %11 = arith.extui %10 : i1 to i32
    %c0_i32_9 = arith.constant 0 : i32
    %12 = arith.cmpi ne, %11, %c0_i32_9 : i32
    scf.if %12 {
      %c0_10 = arith.constant 0 : index
      %c0_11 = arith.constant 0 : index
      %13 = vector.load %arg5[%c0_10, %c0_11] : memref<128x128xf32, #tpu.memory_space<vmem>>, vector<128x128xf32>
      %c0_12 = arith.constant 0 : index
      %c0_13 = arith.constant 0 : index
      %14 = vector.load %arg4[%c0_12, %c0_13] : memref<1x128xf32, #tpu.memory_space<vmem>>, vector<1x128xf32>
      %15 = vector.broadcast %14 : vector<1x128xf32> to vector<128x128xf32>
      %16 = arith.addf %13, %15 : vector<128x128xf32>
      %cst_14 = arith.constant 0.000000e+00 : f32
      %17 = vector.broadcast %cst_14 : f32 to vector<128x128xf32>
      %18 = arith.maximumf %16, %17 : vector<128x128xf32>
      %c0_15 = arith.constant 0 : index
      %c0_16 = arith.constant 0 : index
      %19 = vector.load %arg5[%c0_15, %c0_16] : memref<128x128xf32, #tpu.memory_space<vmem>>, vector<128x128xf32>
      tpu.vector_store %arg5[%c0_15, %c0_16], %18 {strides = array<i32>} : memref<128x128xf32, #tpu.memory_space<vmem>>, vector<128x128xf32>,
      %20 = arith.truncf %18 : vector<128x128xf32> to vector<128x128xbf16>
      %c0_17 = arith.constant 0 : index
      %c0_18 = arith.constant 0 : index
      %21 = vector.load %arg6[%c0_17, %c0_18] : memref<128x128xbf16, #tpu.memory_space<vmem>>, vector<128x128xbf16>
      tpu.vector_store %arg6[%c0_17, %c0_18], %20 {strides = array<i32>} : memref<128x128xbf16, #tpu.memory_space<vmem>>, vector<128x128xbf16>,
    } else {
    }
    return
  }
  func.func @transform_0(%arg0: i32, %arg1: i32) -> (i32, i32) {
    %c0_i32 = arith.constant 0 : i32
    return %arg0, %arg1 : i32, i32
  }
  func.func @transform_1(%arg0: i32, %arg1: i32) -> (i32, i32) {
    %c0_i32 = arith.constant 0 : i32
    %c0_i32_0 = arith.constant 0 : i32
    return %arg1, %c0_i32 : i32, i32
  }
  func.func @transform_2(%arg0: i32, %arg1: i32) -> (i32, i32) {
    %c0_i32 = arith.constant 0 : i32
    %c0_i32_0 = arith.constant 0 : i32
    %c0_i32_1 = arith.constant 0 : i32
    return %c0_i32, %c0_i32_0 : i32, i32
  }
  func.func @transform_3(%arg0: i32, %arg1: i32) -> (i32, i32) {
    %c0_i32 = arith.constant 0 : i32
    %c0_i32_0 = arith.constant 0 : i32
    return %arg0, %c0_i32 : i32, i32
  }
  func.func @transform_4(%arg0: i32, %arg1: i32) -> (i32, i32) {
    %c0_i32 = arith.constant 0 : i32
    %c0_i32_0 = arith.constant 0 : i32
    return %arg0, %c0_i32 : i32, i32
  }
}

module attributes {stable_mosaic.version = 11 : i64} {
  func.func @_graph_conv_kernel(%arg0: i32, %arg1: i32, %arg2: memref<128x128xbf16, #tpu.memory_space<vmem>>, %arg3: memref<128x128xbf16, #tpu.memory_space<vmem>>, %arg4: memref<128x128xf32, #tpu.memory_space<vmem>>, %arg5: memref<128x128xbf16, #tpu.memory_space<vmem>>, %arg6: memref<1x128xf32, #tpu.memory_space<vmem>>, %arg7: memref<128x128xf32, #tpu.memory_space<vmem>>, %arg8: memref<128x128xbf16, #tpu.memory_space<vmem>>) attributes {dimension_semantics = [#tpu.dimension_semantics<parallel>, #tpu.dimension_semantics<arbitrary>], iteration_bounds = array<i64: 1, 1>, scalar_prefetch = 0 : i64, scratch_operands = 0 : i64, tpu.core_type = #tpu.core_type<tc>, window_params = [{transform_indices = @transform_0, window_bounds = array<i64: 128, 128>}, {transform_indices = @transform_1, window_bounds = array<i64: 128, 128>}, {transform_indices = @transform_2, window_bounds = array<i64: 128, 128>}, {pipeline_mode = #tpu.pipeline_mode<synchronous>, transform_indices = @transform_3, window_bounds = array<i64: 128, 128>}, {pipeline_mode = #tpu.pipeline_mode<synchronous>, transform_indices = @transform_4, window_bounds = array<i64: 1, 128>}, {transform_indices = @transform_5, window_bounds = array<i64: 128, 128>}, {transform_indices = @transform_6, window_bounds = array<i64: 128, 128>}]} {
    %c0_i32 = arith.constant 0 : i32
    %0 = arith.cmpi eq, %arg1, %c0_i32 : i32
    %1 = arith.extui %0 : i1 to i32
    %c0_i32_0 = arith.constant 0 : i32
    %2 = arith.cmpi ne, %1, %c0_i32_0 : i32
    scf.if %2 {
      %cst_10 = arith.constant 0.000000e+00 : f32
      %12 = vector.broadcast %cst_10 : f32 to vector<128x128xf32>
      %c0_11 = arith.constant 0 : index
      %c0_12 = arith.constant 0 : index
      %13 = vector.load %arg7[%c0_11, %c0_12] : memref<128x128xf32, #tpu.memory_space<vmem>>, vector<128x128xf32>
      tpu.vector_store %arg7[%c0_11, %c0_12], %12 {strides = array<i32>} : memref<128x128xf32, #tpu.memory_space<vmem>>, vector<128x128xf32>,
    } else {
    }
    %c0 = arith.constant 0 : index
    %c0_1 = arith.constant 0 : index
    %3 = vector.load %arg7[%c0, %c0_1] : memref<128x128xf32, #tpu.memory_space<vmem>>, vector<128x128xf32>
    %c0_2 = arith.constant 0 : index
    %c0_3 = arith.constant 0 : index
    %4 = vector.load %arg2[%c0_2, %c0_3] : memref<128x128xbf16, #tpu.memory_space<vmem>>, vector<128x128xbf16>
    %c0_4 = arith.constant 0 : index
    %c0_5 = arith.constant 0 : index
    %5 = vector.load %arg3[%c0_4, %c0_5] : memref<128x128xbf16, #tpu.memory_space<vmem>>, vector<128x128xbf16>
    %cst = arith.constant dense<0.000000e+00> : vector<128x128xf32>
    %6 = tpu.matmul %4, %5, %cst {dimension_numbers = #tpu.dot_dimension_numbers<[1], [0], [0], [1], [0, 0, 1, 1], [], []>} : vector<128x128xbf16>, vector<128x128xbf16>, vector<128x128xf32> -> vector<128x128xf32>
    %7 = arith.addf %3, %6 : vector<128x128xf32>
    %c0_6 = arith.constant 0 : index
    %c0_7 = arith.constant 0 : index
    %8 = vector.load %arg7[%c0_6, %c0_7] : memref<128x128xf32, #tpu.memory_space<vmem>>, vector<128x128xf32>
    tpu.vector_store %arg7[%c0_6, %c0_7], %7 {strides = array<i32>} : memref<128x128xf32, #tpu.memory_space<vmem>>, vector<128x128xf32>,
    %c0_i32_8 = arith.constant 0 : i32
    %9 = arith.cmpi eq, %arg1, %c0_i32_8 : i32
    %10 = arith.extui %9 : i1 to i32
    %c0_i32_9 = arith.constant 0 : i32
    %11 = arith.cmpi ne, %10, %c0_i32_9 : i32
    scf.if %11 {
      %c0_10 = arith.constant 0 : index
      %c0_11 = arith.constant 0 : index
      %12 = vector.load %arg7[%c0_10, %c0_11] : memref<128x128xf32, #tpu.memory_space<vmem>>, vector<128x128xf32>
      %13 = arith.truncf %12 : vector<128x128xf32> to vector<128x128xbf16>
      %c0_12 = arith.constant 0 : index
      %c0_13 = arith.constant 0 : index
      %14 = vector.load %arg5[%c0_12, %c0_13] : memref<128x128xbf16, #tpu.memory_space<vmem>>, vector<128x128xbf16>
      %cst_14 = arith.constant dense<0.000000e+00> : vector<128x128xf32>
      %15 = tpu.matmul %13, %14, %cst_14 {dimension_numbers = #tpu.dot_dimension_numbers<[1], [0], [0], [1], [0, 0, 1, 1], [], []>} : vector<128x128xbf16>, vector<128x128xbf16>, vector<128x128xf32> -> vector<128x128xf32>
      %c0_15 = arith.constant 0 : index
      %c0_16 = arith.constant 0 : index
      %16 = vector.load %arg6[%c0_15, %c0_16] : memref<1x128xf32, #tpu.memory_space<vmem>>, vector<1x128xf32>
      %17 = vector.broadcast %16 : vector<1x128xf32> to vector<128x128xf32>
      %18 = arith.addf %15, %17 : vector<128x128xf32>
      %cst_17 = arith.constant 0.000000e+00 : f32
      %19 = vector.broadcast %cst_17 : f32 to vector<128x128xf32>
      %20 = arith.maximumf %18, %19 : vector<128x128xf32>
      %c0_18 = arith.constant 0 : index
      %c0_19 = arith.constant 0 : index
      %21 = vector.load %arg4[%c0_18, %c0_19] : memref<128x128xf32, #tpu.memory_space<vmem>>, vector<128x128xf32>
      %22 = arith.addf %20, %21 : vector<128x128xf32>
      %c0_20 = arith.constant 0 : index
      %c0_21 = arith.constant 0 : index
      %23 = vector.load %arg7[%c0_20, %c0_21] : memref<128x128xf32, #tpu.memory_space<vmem>>, vector<128x128xf32>
      tpu.vector_store %arg7[%c0_20, %c0_21], %22 {strides = array<i32>} : memref<128x128xf32, #tpu.memory_space<vmem>>, vector<128x128xf32>,
      %24 = arith.truncf %22 : vector<128x128xf32> to vector<128x128xbf16>
      %c0_22 = arith.constant 0 : index
      %c0_23 = arith.constant 0 : index
      %25 = vector.load %arg8[%c0_22, %c0_23] : memref<128x128xbf16, #tpu.memory_space<vmem>>, vector<128x128xbf16>
      tpu.vector_store %arg8[%c0_22, %c0_23], %24 {strides = array<i32>} : memref<128x128xbf16, #tpu.memory_space<vmem>>, vector<128x128xbf16>,
    } else {
    }
    return
  }
  func.func @transform_0(%arg0: i32, %arg1: i32) -> (i32, i32) {
    %c0_i32 = arith.constant 0 : i32
    return %arg0, %arg1 : i32, i32
  }
  func.func @transform_1(%arg0: i32, %arg1: i32) -> (i32, i32) {
    %c0_i32 = arith.constant 0 : i32
    %c0_i32_0 = arith.constant 0 : i32
    return %arg1, %c0_i32 : i32, i32
  }
  func.func @transform_2(%arg0: i32, %arg1: i32) -> (i32, i32) {
    %c0_i32 = arith.constant 0 : i32
    %c0_i32_0 = arith.constant 0 : i32
    return %arg0, %c0_i32 : i32, i32
  }
  func.func @transform_3(%arg0: i32, %arg1: i32) -> (i32, i32) {
    %c0_i32 = arith.constant 0 : i32
    %c0_i32_0 = arith.constant 0 : i32
    %c0_i32_1 = arith.constant 0 : i32
    return %c0_i32, %c0_i32_0 : i32, i32
  }
  func.func @transform_4(%arg0: i32, %arg1: i32) -> (i32, i32) {
    %c0_i32 = arith.constant 0 : i32
    %c0_i32_0 = arith.constant 0 : i32
    %c0_i32_1 = arith.constant 0 : i32
    return %c0_i32, %c0_i32_0 : i32, i32
  }
  func.func @transform_5(%arg0: i32, %arg1: i32) -> (i32, i32) {
    %c0_i32 = arith.constant 0 : i32
    %c0_i32_0 = arith.constant 0 : i32
    return %arg0, %c0_i32 : i32, i32
  }
  func.func @transform_6(%arg0: i32, %arg1: i32) -> (i32, i32) {
    %c0_i32 = arith.constant 0 : i32
    %c0_i32_0 = arith.constant 0 : i32
    return %arg0, %c0_i32 : i32, i32
  }
}

module attributes {stable_mosaic.version = 11 : i64} {
  func.func @_graph_conv_kernel(%arg0: i32, %arg1: i32, %arg2: memref<128x128xbf16, #tpu.memory_space<vmem>>, %arg3: memref<128x128xbf16, #tpu.memory_space<vmem>>, %arg4: memref<128x128xf32, #tpu.memory_space<vmem>>, %arg5: memref<128x128xbf16, #tpu.memory_space<vmem>>, %arg6: memref<1x128xf32, #tpu.memory_space<vmem>>, %arg7: memref<128x128xf32, #tpu.memory_space<vmem>>, %arg8: memref<128x128xbf16, #tpu.memory_space<vmem>>) attributes {dimension_semantics = [#tpu.dimension_semantics<parallel>, #tpu.dimension_semantics<arbitrary>], iteration_bounds = array<i64: 1, 1>, scalar_prefetch = 0 : i64, scratch_operands = 0 : i64, tpu.core_type = #tpu.core_type<tc>, window_params = [{transform_indices = @transform_0, window_bounds = array<i64: 128, 128>}, {transform_indices = @transform_1, window_bounds = array<i64: 128, 128>}, {transform_indices = @transform_2, window_bounds = array<i64: 128, 128>}, {pipeline_mode = #tpu.pipeline_mode<synchronous>, transform_indices = @transform_3, window_bounds = array<i64: 128, 128>}, {pipeline_mode = #tpu.pipeline_mode<synchronous>, transform_indices = @transform_4, window_bounds = array<i64: 1, 128>}, {transform_indices = @transform_5, window_bounds = array<i64: 128, 128>}, {transform_indices = @transform_6, window_bounds = array<i64: 128, 128>}]} {
    %c0_i32 = arith.constant 0 : i32
    %0 = arith.cmpi eq, %arg1, %c0_i32 : i32
    %1 = arith.extui %0 : i1 to i32
    %c0_i32_0 = arith.constant 0 : i32
    %2 = arith.cmpi ne, %1, %c0_i32_0 : i32
    scf.if %2 {
      %cst_10 = arith.constant 0.000000e+00 : f32
      %12 = vector.broadcast %cst_10 : f32 to vector<128x128xf32>
      %c0_11 = arith.constant 0 : index
      %c0_12 = arith.constant 0 : index
      %13 = vector.load %arg7[%c0_11, %c0_12] : memref<128x128xf32, #tpu.memory_space<vmem>>, vector<128x128xf32>
      tpu.vector_store %arg7[%c0_11, %c0_12], %12 {strides = array<i32>} : memref<128x128xf32, #tpu.memory_space<vmem>>, vector<128x128xf32>,
    } else {
    }
    %c0 = arith.constant 0 : index
    %c0_1 = arith.constant 0 : index
    %3 = vector.load %arg7[%c0, %c0_1] : memref<128x128xf32, #tpu.memory_space<vmem>>, vector<128x128xf32>
    %c0_2 = arith.constant 0 : index
    %c0_3 = arith.constant 0 : index
    %4 = vector.load %arg2[%c0_2, %c0_3] : memref<128x128xbf16, #tpu.memory_space<vmem>>, vector<128x128xbf16>
    %c0_4 = arith.constant 0 : index
    %c0_5 = arith.constant 0 : index
    %5 = vector.load %arg3[%c0_4, %c0_5] : memref<128x128xbf16, #tpu.memory_space<vmem>>, vector<128x128xbf16>
    %cst = arith.constant dense<0.000000e+00> : vector<128x128xf32>
    %6 = tpu.matmul %4, %5, %cst {dimension_numbers = #tpu.dot_dimension_numbers<[1], [0], [0], [1], [0, 0, 1, 1], [], []>} : vector<128x128xbf16>, vector<128x128xbf16>, vector<128x128xf32> -> vector<128x128xf32>
    %7 = arith.addf %3, %6 : vector<128x128xf32>
    %c0_6 = arith.constant 0 : index
    %c0_7 = arith.constant 0 : index
    %8 = vector.load %arg7[%c0_6, %c0_7] : memref<128x128xf32, #tpu.memory_space<vmem>>, vector<128x128xf32>
    tpu.vector_store %arg7[%c0_6, %c0_7], %7 {strides = array<i32>} : memref<128x128xf32, #tpu.memory_space<vmem>>, vector<128x128xf32>,
    %c0_i32_8 = arith.constant 0 : i32
    %9 = arith.cmpi eq, %arg1, %c0_i32_8 : i32
    %10 = arith.extui %9 : i1 to i32
    %c0_i32_9 = arith.constant 0 : i32
    %11 = arith.cmpi ne, %10, %c0_i32_9 : i32
    scf.if %11 {
      %c0_10 = arith.constant 0 : index
      %c0_11 = arith.constant 0 : index
      %12 = vector.load %arg7[%c0_10, %c0_11] : memref<128x128xf32, #tpu.memory_space<vmem>>, vector<128x128xf32>
      %13 = arith.truncf %12 : vector<128x128xf32> to vector<128x128xbf16>
      %c0_12 = arith.constant 0 : index
      %c0_13 = arith.constant 0 : index
      %14 = vector.load %arg5[%c0_12, %c0_13] : memref<128x128xbf16, #tpu.memory_space<vmem>>, vector<128x128xbf16>
      %cst_14 = arith.constant dense<0.000000e+00> : vector<128x128xf32>
      %15 = tpu.matmul %13, %14, %cst_14 {dimension_numbers = #tpu.dot_dimension_numbers<[1], [0], [0], [1], [0, 0, 1, 1], [], []>} : vector<128x128xbf16>, vector<128x128xbf16>, vector<128x128xf32> -> vector<128x128xf32>
      %c0_15 = arith.constant 0 : index
      %c0_16 = arith.constant 0 : index
      %16 = vector.load %arg6[%c0_15, %c0_16] : memref<1x128xf32, #tpu.memory_space<vmem>>, vector<1x128xf32>
      %17 = vector.broadcast %16 : vector<1x128xf32> to vector<128x128xf32>
      %18 = arith.addf %15, %17 : vector<128x128xf32>
      %cst_17 = arith.constant 0.000000e+00 : f32
      %19 = vector.broadcast %cst_17 : f32 to vector<128x128xf32>
      %20 = arith.maximumf %18, %19 : vector<128x128xf32>
      %c0_18 = arith.constant 0 : index
      %c0_19 = arith.constant 0 : index
      %21 = vector.load %arg4[%c0_18, %c0_19] : memref<128x128xf32, #tpu.memory_space<vmem>>, vector<128x128xf32>
      %22 = arith.addf %20, %21 : vector<128x128xf32>
      %c0_20 = arith.constant 0 : index
      %c0_21 = arith.constant 0 : index
      %23 = vector.load %arg7[%c0_20, %c0_21] : memref<128x128xf32, #tpu.memory_space<vmem>>, vector<128x128xf32>
      tpu.vector_store %arg7[%c0_20, %c0_21], %22 {strides = array<i32>} : memref<128x128xf32, #tpu.memory_space<vmem>>, vector<128x128xf32>,
      %24 = arith.truncf %22 : vector<128x128xf32> to vector<128x128xbf16>
      %c0_22 = arith.constant 0 : index
      %c0_23 = arith.constant 0 : index
      %25 = vector.load %arg8[%c0_22, %c0_23] : memref<128x128xbf16, #tpu.memory_space<vmem>>, vector<128x128xbf16>
      tpu.vector_store %arg8[%c0_22, %c0_23], %24 {strides = array<i32>} : memref<128x128xbf16, #tpu.memory_space<vmem>>, vector<128x128xbf16>,
    } else {
    }
    return
  }
  func.func @transform_0(%arg0: i32, %arg1: i32) -> (i32, i32) {
    %c0_i32 = arith.constant 0 : i32
    return %arg0, %arg1 : i32, i32
  }
  func.func @transform_1(%arg0: i32, %arg1: i32) -> (i32, i32) {
    %c0_i32 = arith.constant 0 : i32
    %c0_i32_0 = arith.constant 0 : i32
    return %arg1, %c0_i32 : i32, i32
  }
  func.func @transform_2(%arg0: i32, %arg1: i32) -> (i32, i32) {
    %c0_i32 = arith.constant 0 : i32
    %c0_i32_0 = arith.constant 0 : i32
    return %arg0, %c0_i32 : i32, i32
  }
  func.func @transform_3(%arg0: i32, %arg1: i32) -> (i32, i32) {
    %c0_i32 = arith.constant 0 : i32
    %c0_i32_0 = arith.constant 0 : i32
    %c0_i32_1 = arith.constant 0 : i32
    return %c0_i32, %c0_i32_0 : i32, i32
  }
  func.func @transform_4(%arg0: i32, %arg1: i32) -> (i32, i32) {
    %c0_i32 = arith.constant 0 : i32
    %c0_i32_0 = arith.constant 0 : i32
    %c0_i32_1 = arith.constant 0 : i32
    return %c0_i32, %c0_i32_0 : i32, i32
  }
  func.func @transform_5(%arg0: i32, %arg1: i32) -> (i32, i32) {
    %c0_i32 = arith.constant 0 : i32
    %c0_i32_0 = arith.constant 0 : i32
    return %arg0, %c0_i32 : i32, i32
  }
  func.func @transform_6(%arg0: i32, %arg1: i32) -> (i32, i32) {
    %c0_i32 = arith.constant 0 : i32
    %c0_i32_0 = arith.constant 0 : i32
    return %arg0, %c0_i32 : i32, i32
  }
}

</mosaic_0001>

<bundles_post_ra>
// kernel: graph_conv_forward.3
= control target key start
LH: loop header
LB: loop body
LE: loop exit
PB: predicated region body
PF: predicated region fallthrough
CT: control target
= control target key end

     0   :  { %s765_s1 = inlined_call_operand.vmem [shape: bf16[128,128], index: 1, kind: input, shape index: {}]   ;;  %s766_s0 = inlined_call_operand.vmem [shape: f32[128,128], index: 0, kind: input, shape index: {}]   ;;  %s767_s2 = inlined_call_operand.vmem [shape: f32[1,128], index: 2, kind: input, shape index: {}]   ;;  %s768_s3 = inlined_call_operand.vmem [shape: f32[128,128], index: 3, kind: output, shape index: {0}]   ;;  %s769_s4 = inlined_call_operand.vmem [shape: bf16[128,128], index: 4, kind: output, shape index: {1}]  }
   0x1   :  { %v585_v0 = vld [vmem:[%s765_s1] sm:$0xff]   ;;  %v586_v1 = vld [vmem:[%s765_s1 + $0x8] sm:$0xff]   ;;  %v587_v2 = vld [vmem:[%s765_s1 + $0x10] sm:$0xff]  }
   0x2   :  { %536 = vmatprep.subr.bf16.mxu0 %v585_v0  ;;  %568 = vmatprep.subr.bf16.mxu1 %v585_v0  ;;  %v588_v3 = vld [vmem:[%s765_s1 + $0x18] sm:$0xff]   ;;  %v53_v4 = vld [vmem:[%s766_s0] sm:$0xff]  ;;  %v54_v5 = vld [vmem:[%s766_s0 + $0x8] sm:$0xff] }
   0x3   :  { %537 = vmatpush3.bf16.msra.mxu0 %v585_v0  ;;  %576 = vmatpush3.bf16.msra.mxu1 %v585_v0  ;;  %v61_v6 = vld [vmem:[%s766_s0 + $0x40] sm:$0xff]  ;;  %v69_v7 = vpack.c.bf16 %v54_v5, %v53_v4  ;;  %v62_v8 = vld [vmem:[%s766_s0 + $0x48] sm:$0xff]  ;;  %v591_v12 = vld [vmem:[%s765_s1 + $0x30] sm:$0xff]  }
   0x4   :  { %538 = vmatprep.subr.bf16.mxu0 %v586_v1  ;;  %569 = vmatprep.subr.bf16.mxu1 %v586_v1  ;;  %v73_v9 = vpack.c.bf16 %v62_v8, %v61_v6  ;;  %v589_v10 = vld [vmem:[%s765_s1 + $0x20] sm:$0xff]   ;;  %v590_v11 = vld [vmem:[%s765_s1 + $0x28] sm:$0xff]   ;;  %v592_v13 = vld [vmem:[%s765_s1 + $0x38] sm:$0xff]  }
   0x5   :  { %552 = vmatprep.mubr.bf16.mxu0 %v69_v7  ;;  %v55_v14 = vld [vmem:[%s766_s0 + $0x10] sm:$0xff]  ;;  %v56_v15 = vld [vmem:[%s766_s0 + $0x18] sm:$0xff]  ;;  %v57_v18 = vld [vmem:[%s766_s0 + $0x20] sm:$0xff] }
   0x6   :  { %560 = vmatprep.mubr.bf16.mxu1 %v73_v9  ;;  %v63_v16 = vld [vmem:[%s766_s0 + $0x50] sm:$0xff]  ;;  %v64_v17 = vld [vmem:[%s766_s0 + $0x58] sm:$0xff]  ;;  %v58_v19 = vld [vmem:[%s766_s0 + $0x28] sm:$0xff]  ;;  %v70_v22 = vpack.c.bf16 %v56_v15, %v55_v14 }
   0x7   :  { %539 = vmatpush3.bf16.msra.mxu0 %v586_v1  ;;  %577 = vmatpush3.bf16.msra.mxu1 %v586_v1  ;;  %v65_v20 = vld [vmem:[%s766_s0 + $0x60] sm:$0xff]  ;;  %v66_v21 = vld [vmem:[%s766_s0 + $0x68] sm:$0xff]  ;;  %v74_v23 = vpack.c.bf16 %v64_v17, %v63_v16  ;;  %v71_v24 = vpack.c.bf16 %v58_v19, %v57_v18  ;;  %v59_v26 = vld [vmem:[%s766_s0 + $0x30] sm:$0xff] }
   0x8   :  { %540 = vmatprep.subr.bf16.mxu0 %v587_v2  ;;  %570 = vmatprep.subr.bf16.mxu1 %v587_v2  ;;  %v75_v25 = vpack.c.bf16 %v66_v21, %v65_v20  ;;  %v60_v27 = vld [vmem:[%s766_s0 + $0x38] sm:$0xff]  ;;  %v67_v28 = vld [vmem:[%s766_s0 + $0x70] sm:$0xff]  ;;  %v440_v33 = vld [vmem:[%s767_s2] ss:$0 sm:$0xff] }
   0x9   :  { %v68_v29 = vld [vmem:[%s766_s0 + $0x78] sm:$0xff]  ;;  %v72_v30 = vpack.c.bf16 %v60_v27, %v59_v26 }
   0xa   :  { %v76_v31 = vpack.c.bf16 %v68_v29, %v67_v28 }
   0xb   :  { %541 = vmatpush3.bf16.msra.mxu0 %v587_v2  ;;  %578 = vmatpush3.bf16.msra.mxu1 %v587_v2 }
   0xc   :  { %542 = vmatprep.subr.bf16.mxu0 %v588_v3  ;;  %571 = vmatprep.subr.bf16.mxu1 %v588_v3 }
   0xf   :  { %543 = vmatpush3.bf16.msra.mxu0 %v588_v3  ;;  %579 = vmatpush3.bf16.msra.mxu1 %v588_v3 }
  0x10   :  { %544 = vmatprep.subr.bf16.mxu0 %v589_v10  ;;  %572 = vmatprep.subr.bf16.mxu1 %v589_v10 }
  0x13   :  { %545 = vmatpush3.bf16.msra.mxu0 %v589_v10  ;;  %580 = vmatpush3.bf16.msra.mxu1 %v589_v10 }
  0x14   :  { %546 = vmatprep.subr.bf16.mxu0 %v590_v11  ;;  %573 = vmatprep.subr.bf16.mxu1 %v590_v11 }
  0x17   :  { %547 = vmatpush3.bf16.msra.mxu0 %v590_v11  ;;  %581 = vmatpush3.bf16.msra.mxu1 %v590_v11 }
  0x18   :  { %548 = vmatprep.subr.bf16.mxu0 %v591_v12  ;;  %574 = vmatprep.subr.bf16.mxu1 %v591_v12 }
  0x1b   :  { %549 = vmatpush3.bf16.msra.mxu0 %v591_v12  ;;  %582 = vmatpush3.bf16.msra.mxu1 %v591_v12 }
  0x1c   :  { %550 = vmatprep.subr.bf16.mxu0 %v592_v13  ;;  %575 = vmatprep.subr.bf16.mxu1 %v592_v13 }
  0x1f   :  { %551 = vmatpush3.bf16.msra.mxu0 %v592_v13  ;;  %583 = vmatpush3.bf16.msra.mxu1 %v592_v13 }
  0x22   :  { %553 = vmatmul.mubr.bf16.vlgmr.msra.gmra.mrb[0].mxu0 %v70_v22  ;;  %561 = vmatmul.mubr.bf16.vlgmr.msra.gmra.mrb[0].mxu1 %v74_v23 }
  0x23   :  { %556 = vmatprep.mubr.bf16.mxu0 %v71_v24  ;;  %564 = vmatprep.mubr.bf16.mxu1 %v75_v25 }
  0x2a   :  { %557 = vmatmul.mubr.bf16.gmra.mrb[4].mxu0 %v72_v30  ;;  %565 = vmatmul.mubr.bf16.gmra.mrb[4].mxu1 %v76_v31 }
  0xf5   :  { %v554_v32 = vpop.f32.mrb[0].mxu0  ;;  %v562_v34 = vpop.f32.mrb[0].mxu1 }
  0xf6   :  { %v175_v35 = vpop.f32.mrb[1].mxu0  ;;  %v207_v36 = vpop.f32.mrb[1].mxu1  ;;  %v298_v39 = vadd.f32 %v554_v32, %v440_v33  ;;  %v306_v40 = vadd.f32 %v562_v34, %v440_v33 }
  0xf7   :  { %v555_v37 = vpop.f32.mrb[2].mxu0  ;;  %v563_v38 = vpop.f32.mrb[2].mxu1  ;;  %v296_v43 = vadd.f32 %v440_v33, %v175_v35  ;;  %v304_v44 = vadd.f32 %v440_v33, %v207_v36 }
  0xf8   :  { %v178_v41 = vpop.f32.mrb[3].mxu0  ;;  %v210_v42 = vpop.f32.mrb[3].mxu1  ;;  %v314_v45 = vmax.f32 %v298_v39, 0.0  ;;  %v322_v46 = vmax.f32 %v306_v40, 0.0  ;;  %v299_v47 = vadd.f32 %v555_v37, %v440_v33  ;;  %v307_v48 = vadd.f32 %v563_v38, %v440_v33 }
  0xf9   :  { %v312_v49 = vmax.f32 %v296_v43, 0.0  ;;  %v320_v50 = vmax.f32 %v304_v44, 0.0  ;;  %v297_v51 = vadd.f32 %v440_v33, %v178_v41  ;;  %v305_v52 = vadd.f32 %v440_v33, %v210_v42 }
  0xfa   :  { %330 = vst [vmem:[%s768_s3 + $0x10] sm:$0xff] %v314_v45  ;;  %338 = vst [vmem:[%s768_s3 + $0x50] sm:$0xff] %v322_v46  ;;  %v315_v53 = vmax.f32 %v299_v47, 0.0  ;;  %v323_v54 = vmax.f32 %v307_v48, 0.0 }
  0xfb   :  { %328 = vst [vmem:[%s768_s3] sm:$0xff] %v312_v49  ;;  %336 = vst [vmem:[%s768_s3 + $0x40] sm:$0xff] %v320_v50  ;;  %v313_v55 = vmax.f32 %v297_v51, 0.0  ;;  %v321_v56 = vmax.f32 %v305_v52, 0.0 }
  0xfc   :  { %331 = vst [vmem:[%s768_s3 + $0x18] sm:$0xff] %v315_v53  ;;  %v481_v59 = vpack.c.bf16 %v315_v53, %v314_v45  ;;  %339 = vst [vmem:[%s768_s3 + $0x58] sm:$0xff] %v323_v54  ;;  %v501_v60 = vpack.c.bf16 %v323_v54, %v322_v46 }
  0xfd   :  { %v558_v57 = vpop.f32.mrb[4].mxu0  ;;  %v566_v58 = vpop.f32.mrb[4].mxu1  ;;  %329 = vst [vmem:[%s768_s3 + $0x8] sm:$0xff] %v313_v55  ;;  %v476_v63 = vpack.c.bf16 %v313_v55, %v312_v49  ;;  %337 = vst [vmem:[%s768_s3 + $0x48] sm:$0xff] %v321_v56  ;;  %v496_v0 = vpack.c.bf16 %v321_v56, %v320_v50 }
  0xfe   :  { %v191_v61 = vpop.f32.mrb[5].mxu0  ;;  %v223_v62 = vpop.f32.mrb[5].mxu1  ;;  %513 = vst [vmem:[%s769_s4 + $0x8] sm:$0xff] %v481_v59   ;;  %517 = vst [vmem:[%s769_s4 + $0x28] sm:$0xff] %v501_v60   ;;  %v302_v3 = vadd.f32 %v558_v57, %v440_v33  ;;  %v310_v4 = vadd.f32 %v566_v58, %v440_v33 }
  0xff   :  { %v559_v1 = vpop.f32.mrb[6].mxu0  ;;  %v567_v2 = vpop.f32.mrb[6].mxu1  ;;  %477 = vst [vmem:[%s769_s4] sm:$0xff] %v476_v63   ;;  %516 = vst [vmem:[%s769_s4 + $0x20] sm:$0xff] %v496_v0   ;;  %v300_v7 = vadd.f32 %v440_v33, %v191_v61  ;;  %v308_v8 = vadd.f32 %v440_v33, %v223_v62 }
 0x100   :  { %v194_v5 = vpop.f32.mrb[7].mxu0  ;;  %v226_v6 = vpop.f32.mrb[7].mxu1  ;;  %v318_v9 = vmax.f32 %v302_v3, 0.0  ;;  %v326_v10 = vmax.f32 %v310_v4, 0.0  ;;  %v303_v11 = vadd.f32 %v559_v1, %v440_v33  ;;  %v311_v12 = vadd.f32 %v567_v2, %v440_v33 }
 0x101   :  { %v316_v13 = vmax.f32 %v300_v7, 0.0  ;;  %v324_v14 = vmax.f32 %v308_v8, 0.0  ;;  %v301_v15 = vadd.f32 %v440_v33, %v194_v5  ;;  %v309_v16 = vadd.f32 %v440_v33, %v226_v6 }
 0x102   :  { %334 = vst [vmem:[%s768_s3 + $0x30] sm:$0xff] %v318_v9  ;;  %342 = vst [vmem:[%s768_s3 + $0x70] sm:$0xff] %v326_v10  ;;  %v319_v17 = vmax.f32 %v303_v11, 0.0  ;;  %v327_v18 = vmax.f32 %v311_v12, 0.0 }
 0x103   :  { %332 = vst [vmem:[%s768_s3 + $0x20] sm:$0xff] %v316_v13  ;;  %340 = vst [vmem:[%s768_s3 + $0x60] sm:$0xff] %v324_v14  ;;  %v317_v19 = vmax.f32 %v301_v15, 0.0  ;;  %v325_v20 = vmax.f32 %v309_v16, 0.0 }
 0x104   :  { %335 = vst [vmem:[%s768_s3 + $0x38] sm:$0xff] %v319_v17  ;;  %v491_v21 = vpack.c.bf16 %v319_v17, %v318_v9  ;;  %343 = vst [vmem:[%s768_s3 + $0x78] sm:$0xff] %v327_v18  ;;  %v511_v22 = vpack.c.bf16 %v327_v18, %v326_v10 }
 0x105   :  { %333 = vst [vmem:[%s768_s3 + $0x28] sm:$0xff] %v317_v19  ;;  %v486_v23 = vpack.c.bf16 %v317_v19, %v316_v13  ;;  %341 = vst [vmem:[%s768_s3 + $0x68] sm:$0xff] %v325_v20  ;;  %v506_v24 = vpack.c.bf16 %v325_v20, %v324_v14 }
 0x106   :  { %515 = vst [vmem:[%s769_s4 + $0x18] sm:$0xff] %v491_v21   ;;  %519 = vst [vmem:[%s769_s4 + $0x38] sm:$0xff] %v511_v22  }
 0x107   :  { %514 = vst [vmem:[%s769_s4 + $0x10] sm:$0xff] %v486_v23   ;;  %518 = vst [vmem:[%s769_s4 + $0x30] sm:$0xff] %v506_v24  }

// kernel: graph_conv_forward.4
= control target key start
LH: loop header
LB: loop body
LE: loop exit
PB: predicated region body
PF: predicated region fallthrough
CT: control target
= control target key end

     0   :  { %s1136_s1 = inlined_call_operand.vmem [shape: bf16[128,128], index: 1, kind: input, shape index: {}]   ;;  %s1137_s0 = inlined_call_operand.vmem [shape: bf16[128,128], index: 0, kind: input, shape index: {}]   ;;  %s1138_s3 = inlined_call_operand.vmem [shape: bf16[128,128], index: 3, kind: input, shape index: {}]   ;;  %s1139_s4 = inlined_call_operand.vmem [shape: f32[1,128], index: 4, kind: input, shape index: {}]   ;;  %s1140_s2 = inlined_call_operand.vmem [shape: f32[128,128], index: 2, kind: input, shape index: {}]   ;;  %s1141_s5 = inlined_call_operand.vmem [shape: f32[128,128], index: 5, kind: output, shape index: {0}]   ;;  %s1142_s6 = inlined_call_operand.vmem [shape: bf16[128,128], index: 6, kind: output, shape index: {1}]  }
   0x1   :  { %v864_v0 = vld [vmem:[%s1136_s1] sm:$0xff]   ;;  %v865_v1 = vld [vmem:[%s1136_s1 + $0x8] sm:$0xff]   ;;  %v866_v2 = vld [vmem:[%s1136_s1 + $0x10] sm:$0xff]  }
   0x2   :  { %799 = vmatprep.subr.bf16.mxu0 %v864_v0  ;;  %v867_v3 = vld [vmem:[%s1136_s1 + $0x18] sm:$0xff]   ;;  %v872_v4 = vld [vmem:[%s1137_s0] sm:$0xff]   ;;  %v869_v6 = vld [vmem:[%s1136_s1 + $0x28] sm:$0xff]  }
   0x3   :  { %800 = vmatpush3.bf16.msra.mxu0 %v864_v0  ;;  %815 = vmatprep.mubr.bf16.mxu0 %v872_v4  ;;  %v868_v5 = vld [vmem:[%s1136_s1 + $0x20] sm:$0xff]   ;;  %v881_v8 = vld [vmem:[%s1138_s3 + $0x8] sm:$0xff]   ;;  %v870_v9 = vld [vmem:[%s1136_s1 + $0x30] sm:$0xff]  }
   0x4   :  { %801 = vmatprep.subr.bf16.mxu0 %v865_v1  ;;  %v880_v7 = vld [vmem:[%s1138_s3] sm:$0xff]   ;;  %v882_v10 = vld [vmem:[%s1138_s3 + $0x10] sm:$0xff]   ;;  %v871_v11 = vld [vmem:[%s1136_s1 + $0x38] sm:$0xff]  }
   0x5   :  { %831 = vmatprep.subr.bf16.mxu1 %v880_v7  ;;  %v883_v12 = vld [vmem:[%s1138_s3 + $0x18] sm:$0xff]   ;;  %v873_v13 = vld [vmem:[%s1137_s0 + $0x8] sm:$0xff]   ;;  %v874_v14 = vld [vmem:[%s1137_s0 + $0x10] sm:$0xff]  }
   0x6   :  { %832 = vmatpush3.bf16.msra.mxu1 %v880_v7  ;;  %v875_v15 = vld [vmem:[%s1137_s0 + $0x18] sm:$0xff]   ;;  %v876_v16 = vld [vmem:[%s1137_s0 + $0x20] sm:$0xff]   ;;  %v877_v17 = vld [vmem:[%s1137_s0 + $0x28] sm:$0xff]  }
   0x7   :  { %802 = vmatpush3.bf16.msra.mxu0 %v865_v1  ;;  %833 = vmatprep.subr.bf16.mxu1 %v881_v8  ;;  %v878_v18 = vld [vmem:[%s1137_s0 + $0x30] sm:$0xff]   ;;  %v879_v19 = vld [vmem:[%s1137_s0 + $0x38] sm:$0xff]   ;;  %v884_v20 = vld [vmem:[%s1138_s3 + $0x20] sm:$0xff]  }
   0x8   :  { %803 = vmatprep.subr.bf16.mxu0 %v866_v2  ;;  %v885_v21 = vld [vmem:[%s1138_s3 + $0x28] sm:$0xff]   ;;  %v886_v22 = vld [vmem:[%s1138_s3 + $0x30] sm:$0xff]   ;;  %v887_v23 = vld [vmem:[%s1138_s3 + $0x38] sm:$0xff]  }
   0x9   :  { %v998_v48 = vld [vmem:[%s1139_s4] ss:$0 sm:$0xff]  ;;  %v529_v52 = vld [vmem:[%s1140_s2 + $0x10] sm:$0xff]  ;;  %v530_v60 = vld [vmem:[%s1140_s2 + $0x18] sm:$0xff] }
   0xa   :  { %834 = vmatpush3.bf16.msra.mxu1 %v881_v8  ;;  %v527_v56 = vld [vmem:[%s1140_s2] sm:$0xff]  ;;  %v528_v0 = vld [vmem:[%s1140_s2 + $0x8] sm:$0xff] }
   0xb   :  { %804 = vmatpush3.bf16.msra.mxu0 %v866_v2  ;;  %835 = vmatprep.subr.bf16.mxu1 %v882_v10 }
   0xc   :  { %805 = vmatprep.subr.bf16.mxu0 %v867_v3 }
   0xe   :  { %836 = vmatpush3.bf16.msra.mxu1 %v882_v10  ;;  %v533_v10 = vld [vmem:[%s1140_s2 + $0x30] sm:$0xff] }
   0xf   :  { %806 = vmatpush3.bf16.msra.mxu0 %v867_v3  ;;  %837 = vmatprep.subr.bf16.mxu1 %v883_v12 }
  0x10   :  { %807 = vmatprep.subr.bf16.mxu0 %v868_v5 }
  0x12   :  { %838 = vmatpush3.bf16.msra.mxu1 %v883_v12 }
  0x13   :  { %808 = vmatpush3.bf16.msra.mxu0 %v868_v5  ;;  %839 = vmatprep.subr.bf16.mxu1 %v884_v20 }
  0x14   :  { %809 = vmatprep.subr.bf16.mxu0 %v869_v6 }
  0x16   :  { %840 = vmatpush3.bf16.msra.mxu1 %v884_v20 }
  0x17   :  { %810 = vmatpush3.bf16.msra.mxu0 %v869_v6  ;;  %841 = vmatprep.subr.bf16.mxu1 %v885_v21 }
  0x18   :  { %811 = vmatprep.subr.bf16.mxu0 %v870_v9 }
  0x1a   :  { %842 = vmatpush3.bf16.msra.mxu1 %v885_v21 }
  0x1b   :  { %812 = vmatpush3.bf16.msra.mxu0 %v870_v9  ;;  %843 = vmatprep.subr.bf16.mxu1 %v886_v22 }
  0x1c   :  { %813 = vmatprep.subr.bf16.mxu0 %v871_v11 }
  0x1e   :  { %844 = vmatpush3.bf16.msra.mxu1 %v886_v22  ;;  %v532_v22 = vld [vmem:[%s1140_s2 + $0x28] sm:$0xff] }
  0x1f   :  { %814 = vmatpush3.bf16.msra.mxu0 %v871_v11  ;;  %845 = vmatprep.subr.bf16.mxu1 %v887_v23 }
  0x22   :  { %816 = vmatmul.mubr.bf16.vlgmr.msra.gmra.mrb[0].mxu0 %v873_v13  ;;  %846 = vmatpush3.bf16.msra.mxu1 %v887_v23 }
  0x23   :  { %819 = vmatprep.mubr.bf16.mxu0 %v874_v14  ;;  %v531_v14 = vld [vmem:[%s1140_s2 + $0x20] sm:$0xff] }
  0x2a   :  { %820 = vmatmul.mubr.bf16.gmra.mrb[4].mxu0 %v875_v15 }
  0x2b   :  { %823 = vmatprep.mubr.bf16.mxu0 %v876_v16 }
  0x32   :  { %824 = vmatmul.mubr.bf16.gmra.mrb[8].mxu0 %v877_v17 }
  0x33   :  { %827 = vmatprep.mubr.bf16.mxu0 %v878_v18  ;;  %v534_v18 = vld [vmem:[%s1140_s2 + $0x38] sm:$0xff] }
  0x3a   :  { %828 = vmatmul.mubr.bf16.gmra.mrb[12].mxu0 %v879_v19 }
  0xf5   :  { %v817_v24 = vpop.f32.mrb[0].mxu0 }
  0xf6   :  { %v221_v25 = vpop.f32.mrb[1].mxu0 }
  0xf7   :  { %v818_v26 = vpop.f32.mrb[2].mxu0 }
  0xf8   :  { %v224_v27 = vpop.f32.mrb[3].mxu0  ;;  %v336_v28 = vpack.c.bf16 %v818_v26, %v817_v24 }
  0xf9   :  { %v335_v29 = vpack.c.bf16 %v224_v27, %v221_v25 }
  0xfb   :  { %847 = vmatprep.mubr.bf16.mxu1 %v335_v29 }
  0xfc   :  { %848 = vmatmul.mubr.bf16.vlgmr.msra.gmra.mrb[0].mxu1 %v336_v28 }
  0xfd   :  { %v821_v30 = vpop.f32.mrb[4].mxu0 }
  0xfe   :  { %v237_v31 = vpop.f32.mrb[5].mxu0 }
  0xff   :  { %v822_v32 = vpop.f32.mrb[6].mxu0 }
 0x100   :  { %v240_v33 = vpop.f32.mrb[7].mxu0  ;;  %v338_v34 = vpack.c.bf16 %v822_v32, %v821_v30  ;;  %v537_v32 = vld [vmem:[%s1140_s2 + $0x50] sm:$0xff] }
 0x101   :  { %v337_v35 = vpack.c.bf16 %v240_v33, %v237_v31 }
 0x103   :  { %851 = vmatprep.mubr.bf16.mxu1 %v337_v35 }
 0x104   :  { %852 = vmatmul.mubr.bf16.gmra.mrb[4].mxu1 %v338_v34 }
 0x105   :  { %v825_v36 = vpop.f32.mrb[8].mxu0 }
 0x106   :  { %v253_v37 = vpop.f32.mrb[9].mxu0 }
 0x107   :  { %v826_v38 = vpop.f32.mrb[10].mxu0 }
 0x108   :  { %v256_v39 = vpop.f32.mrb[11].mxu0  ;;  %v340_v40 = vpack.c.bf16 %v826_v38, %v825_v36  ;;  %v535_v36 = vld [vmem:[%s1140_s2 + $0x40] sm:$0xff] }
 0x109   :  { %v339_v41 = vpack.c.bf16 %v256_v39, %v253_v37 }
 0x10b   :  { %855 = vmatprep.mubr.bf16.mxu1 %v339_v41 }
 0x10c   :  { %856 = vmatmul.mubr.bf16.gmra.mrb[8].mxu1 %v340_v40  ;;  %v538_v40 = vld [vmem:[%s1140_s2 + $0x58] sm:$0xff] }
 0x10d   :  { %v829_v42 = vpop.f32.mrb[12].mxu0 }
 0x10e   :  { %v269_v43 = vpop.f32.mrb[13].mxu0 }
 0x10f   :  { %v830_v44 = vpop.f32.mrb[14].mxu0 }
 0x110   :  { %v272_v45 = vpop.f32.mrb[15].mxu0  ;;  %v342_v46 = vpack.c.bf16 %v830_v44, %v829_v42  ;;  %v536_v44 = vld [vmem:[%s1140_s2 + $0x48] sm:$0xff] }
 0x111   :  { %v341_v47 = vpack.c.bf16 %v272_v45, %v269_v43 }
 0x113   :  { %859 = vmatprep.mubr.bf16.mxu1 %v341_v47 }
 0x114   :  { %860 = vmatmul.mubr.bf16.gmra.mrb[12].mxu1 %v342_v46 }
 0x1cf   :  { %v849_v49 = vpop.f32.mrb[0].mxu1 }
 0x1d0   :  { %v457_v50 = vadd.f32 %v849_v49, %v998_v48  ;;  %v448_v51 = vpop.f32.mrb[1].mxu1 }
 0x1d1   :  { %v449_v53 = vadd.f32 %v998_v48, %v448_v51  ;;  %v850_v54 = vpop.f32.mrb[2].mxu1 }
 0x1d2   :  { %v513_v55 = vmax.f32 %v457_v50, 0.0  ;;  %v460_v57 = vadd.f32 %v850_v54, %v998_v48  ;;  %v451_v58 = vpop.f32.mrb[3].mxu1 }
 0x1d3   :  { %v511_v59 = vmax.f32 %v449_v53, 0.0  ;;  %v452_v61 = vadd.f32 %v998_v48, %v451_v58 }
 0x1d4   :  { %v545_v62 = vadd.f32 %v529_v52, %v513_v55  ;;  %v514_v63 = vmax.f32 %v460_v57, 0.0  ;;  %v541_v55 = vld [vmem:[%s1140_s2 + $0x70] sm:$0xff] }
 0x1d5   :  { %v543_v1 = vadd.f32 %v527_v56, %v511_v59  ;;  %v512_v2 = vmax.f32 %v452_v61, 0.0  ;;  %v539_v59 = vld [vmem:[%s1140_s2 + $0x60] sm:$0xff] }
 0x1d6   :  { %561 = vst [vmem:[%s1141_s5 + $0x10] sm:$0xff] %v545_v62  ;;  %v546_v3 = vadd.f32 %v530_v60, %v514_v63  ;;  %v542_v63 = vld [vmem:[%s1140_s2 + $0x78] sm:$0xff] }
 0x1d7   :  { %559 = vst [vmem:[%s1141_s5] sm:$0xff] %v543_v1  ;;  %v544_v4 = vadd.f32 %v528_v0, %v512_v2  ;;  %v853_v5 = vpop.f32.mrb[4].mxu1 }
 0x1d8   :  { %562 = vst [vmem:[%s1141_s5 + $0x18] sm:$0xff] %v546_v3  ;;  %v728_v6 = vpack.c.bf16 %v546_v3, %v545_v62  ;;  %v473_v7 = vadd.f32 %v853_v5, %v998_v48  ;;  %v464_v8 = vpop.f32.mrb[5].mxu1  ;;  %v540_v3 = vld [vmem:[%s1140_s2 + $0x68] sm:$0xff] }
 0x1d9   :  { %560 = vst [vmem:[%s1141_s5 + $0x8] sm:$0xff] %v544_v4  ;;  %v723_v9 = vpack.c.bf16 %v544_v4, %v543_v1  ;;  %v465_v11 = vadd.f32 %v998_v48, %v464_v8  ;;  %v854_v12 = vpop.f32.mrb[6].mxu1 }
 0x1da   :  { %760 = vst [vmem:[%s1142_s6 + $0x8] sm:$0xff] %v728_v6   ;;  %v517_v13 = vmax.f32 %v473_v7, 0.0  ;;  %v476_v15 = vadd.f32 %v854_v12, %v998_v48  ;;  %v467_v16 = vpop.f32.mrb[7].mxu1 }
 0x1db   :  { %724 = vst [vmem:[%s1142_s6] sm:$0xff] %v723_v9   ;;  %v515_v17 = vmax.f32 %v465_v11, 0.0  ;;  %v468_v19 = vadd.f32 %v998_v48, %v467_v16 }
 0x1dc   :  { %v549_v20 = vadd.f32 %v533_v10, %v517_v13  ;;  %v518_v21 = vmax.f32 %v476_v15, 0.0 }
 0x1dd   :  { %v547_v23 = vadd.f32 %v531_v14, %v515_v17  ;;  %v516_v24 = vmax.f32 %v468_v19, 0.0 }
 0x1de   :  { %565 = vst [vmem:[%s1141_s5 + $0x30] sm:$0xff] %v549_v20  ;;  %v550_v25 = vadd.f32 %v534_v18, %v518_v21 }
 0x1df   :  { %563 = vst [vmem:[%s1141_s5 + $0x20] sm:$0xff] %v547_v23  ;;  %v548_v26 = vadd.f32 %v532_v22, %v516_v24  ;;  %v857_v27 = vpop.f32.mrb[8].mxu1 }
 0x1e0   :  { %566 = vst [vmem:[%s1141_s5 + $0x38] sm:$0xff] %v550_v25  ;;  %v738_v28 = vpack.c.bf16 %v550_v25, %v549_v20  ;;  %v489_v29 = vadd.f32 %v857_v27, %v998_v48  ;;  %v480_v30 = vpop.f32.mrb[9].mxu1 }
 0x1e1   :  { %564 = vst [vmem:[%s1141_s5 + $0x28] sm:$0xff] %v548_v26  ;;  %v733_v31 = vpack.c.bf16 %v548_v26, %v547_v23  ;;  %v481_v33 = vadd.f32 %v998_v48, %v480_v30  ;;  %v858_v34 = vpop.f32.mrb[10].mxu1 }
 0x1e2   :  { %762 = vst [vmem:[%s1142_s6 + $0x18] sm:$0xff] %v738_v28   ;;  %v521_v35 = vmax.f32 %v489_v29, 0.0  ;;  %v492_v37 = vadd.f32 %v858_v34, %v998_v48  ;;  %v483_v38 = vpop.f32.mrb[11].mxu1 }
 0x1e3   :  { %761 = vst [vmem:[%s1142_s6 + $0x10] sm:$0xff] %v733_v31   ;;  %v519_v39 = vmax.f32 %v481_v33, 0.0  ;;  %v484_v41 = vadd.f32 %v998_v48, %v483_v38 }
 0x1e4   :  { %v553_v42 = vadd.f32 %v537_v32, %v521_v35  ;;  %v522_v43 = vmax.f32 %v492_v37, 0.0 }
 0x1e5   :  { %v551_v45 = vadd.f32 %v535_v36, %v519_v39  ;;  %v520_v46 = vmax.f32 %v484_v41, 0.0 }
 0x1e6   :  { %569 = vst [vmem:[%s1141_s5 + $0x50] sm:$0xff] %v553_v42  ;;  %v554_v47 = vadd.f32 %v538_v40, %v522_v43 }
 0x1e7   :  { %567 = vst [vmem:[%s1141_s5 + $0x40] sm:$0xff] %v551_v45  ;;  %v552_v49 = vadd.f32 %v536_v44, %v520_v46  ;;  %v861_v50 = vpop.f32.mrb[12].mxu1 }
 0x1e8   :  { %570 = vst [vmem:[%s1141_s5 + $0x58] sm:$0xff] %v554_v47  ;;  %v748_v51 = vpack.c.bf16 %v554_v47, %v553_v42  ;;  %v505_v52 = vadd.f32 %v861_v50, %v998_v48  ;;  %v496_v53 = vpop.f32.mrb[13].mxu1 }
 0x1e9   :  { %568 = vst [vmem:[%s1141_s5 + $0x48] sm:$0xff] %v552_v49  ;;  %v743_v54 = vpack.c.bf16 %v552_v49, %v551_v45  ;;  %v497_v56 = vadd.f32 %v998_v48, %v496_v53  ;;  %v862_v57 = vpop.f32.mrb[14].mxu1 }
 0x1ea   :  { %764 = vst [vmem:[%s1142_s6 + $0x28] sm:$0xff] %v748_v51   ;;  %v525_v58 = vmax.f32 %v505_v52, 0.0  ;;  %v508_v60 = vadd.f32 %v862_v57, %v998_v48  ;;  %v499_v61 = vpop.f32.mrb[15].mxu1 }
 0x1eb   :  { %763 = vst [vmem:[%s1142_s6 + $0x20] sm:$0xff] %v743_v54   ;;  %v523_v62 = vmax.f32 %v497_v56, 0.0  ;;  %v500_v0 = vadd.f32 %v998_v48, %v499_v61 }
 0x1ec   :  { %v557_v1 = vadd.f32 %v541_v55, %v525_v58  ;;  %v526_v2 = vmax.f32 %v508_v60, 0.0 }
 0x1ed   :  { %v555_v4 = vadd.f32 %v539_v59, %v523_v62  ;;  %v524_v5 = vmax.f32 %v500_v0, 0.0 }
 0x1ee   :  { %573 = vst [vmem:[%s1141_s5 + $0x70] sm:$0xff] %v557_v1  ;;  %v558_v6 = vadd.f32 %v542_v63, %v526_v2 }
 0x1ef   :  { %571 = vst [vmem:[%s1141_s5 + $0x60] sm:$0xff] %v555_v4  ;;  %v556_v7 = vadd.f32 %v540_v3, %v524_v5 }
 0x1f0   :  { %574 = vst [vmem:[%s1141_s5 + $0x78] sm:$0xff] %v558_v6  ;;  %v758_v48 = vpack.c.bf16 %v558_v6, %v557_v1 }
 0x1f1   :  { %572 = vst [vmem:[%s1141_s5 + $0x68] sm:$0xff] %v556_v7  ;;  %v753_v8 = vpack.c.bf16 %v556_v7, %v555_v4 }
 0x1f2   :  { %766 = vst [vmem:[%s1142_s6 + $0x38] sm:$0xff] %v758_v48  }
 0x1f3   :  { %765 = vst [vmem:[%s1142_s6 + $0x30] sm:$0xff] %v753_v8  }

// kernel: graph_conv_forward.5
= control target key start
LH: loop header
LB: loop body
LE: loop exit
PB: predicated region body
PF: predicated region fallthrough
CT: control target
= control target key end

     0   :  { %s1167_s0 = inlined_call_operand.vmem [shape: bf16[128,128], index: 0, kind: input, shape index: {}]   ;;  %s1168_s1 = inlined_call_operand.vmem [shape: bf16[128,128], index: 1, kind: input, shape index: {}]   ;;  %s1169_s2 = inlined_call_operand.vmem [shape: f32[128,128], index: 2, kind: input, shape index: {}]   ;;  %s1170_s3 = inlined_call_operand.vmem [shape: bf16[128,128], index: 3, kind: input, shape index: {}]   ;;  %s1171_s4 = inlined_call_operand.vmem [shape: f32[1,128], index: 4, kind: input, shape index: {}]   ;;  %s1172_s5 = inlined_call_operand.vmem [shape: f32[128,128], index: 5, kind: output, shape index: {0}]   ;;  %s1173_s6 = inlined_call_operand.hbm [shape: bf16[128,128], index: 6, kind: output, shape index: {1}]  }
   0x1   :  { %v880_v0 = vld [vmem:[%s1168_s1] sm:$0xff]   ;;  %v881_v1 = vld [vmem:[%s1168_s1 + $0x8] sm:$0xff]   ;;  %v882_v2 = vld [vmem:[%s1168_s1 + $0x10] sm:$0xff]  }
   0x2   :  { %812 = vmatprep.subr.bf16.mxu0 %v880_v0  ;;  %v883_v3 = vld [vmem:[%s1168_s1 + $0x18] sm:$0xff]   ;;  %v888_v4 = vld [vmem:[%s1167_s0] sm:$0xff]   ;;  %v885_v6 = vld [vmem:[%s1168_s1 + $0x28] sm:$0xff]  }
   0x3   :  { %813 = vmatpush3.bf16.msra.mxu0 %v880_v0  ;;  %828 = vmatprep.mubr.bf16.mxu0 %v888_v4  ;;  %v884_v5 = vld [vmem:[%s1168_s1 + $0x20] sm:$0xff]   ;;  %v897_v8 = vld [vmem:[%s1170_s3 + $0x8] sm:$0xff]   ;;  %v886_v9 = vld [vmem:[%s1168_s1 + $0x30] sm:$0xff]  }
   0x4   :  { %814 = vmatprep.subr.bf16.mxu0 %v881_v1  ;;  %v896_v7 = vld [vmem:[%s1170_s3] sm:$0xff]   ;;  %v898_v10 = vld [vmem:[%s1170_s3 + $0x10] sm:$0xff]  }
   0x5   :  { %844 = vmatprep.subr.bf16.mxu1 %v896_v7 }
   0x6   :  { %845 = vmatpush3.bf16.msra.mxu1 %v896_v7 }
   0x7   :  { %815 = vmatpush3.bf16.msra.mxu0 %v881_v1  ;;  %846 = vmatprep.subr.bf16.mxu1 %v897_v8 }
   0x8   :  { %816 = vmatprep.subr.bf16.mxu0 %v882_v2 }
   0xb   :  { %817 = vmatpush3.bf16.msra.mxu0 %v882_v2 }
   0xc   :  { %818 = vmatprep.subr.bf16.mxu0 %v883_v3 }
   0xf   :  { %819 = vmatpush3.bf16.msra.mxu0 %v883_v3 }
  0x10   :  { %820 = vmatprep.subr.bf16.mxu0 %v884_v5 }
  0x13   :  { %821 = vmatpush3.bf16.msra.mxu0 %v884_v5 }
  0x14   :  { %822 = vmatprep.subr.bf16.mxu0 %v885_v6 }
  0x15   :  { %12 = vsyncpa [#allocation3], 0  ;;  %847 = vmatpush3.bf16.msra.mxu1 %v897_v8  ;;  %v887_v11 = vld [vmem:[%s1168_s1 + $0x38] sm:$0xff]   ;;  %v889_v13 = vld [vmem:[%s1167_s0 + $0x8] sm:$0xff]   ;;  %s928_s20 = smov [#allocation2]  }
  0x16   :  { %848 = vmatprep.subr.bf16.mxu1 %v898_v10  ;;  %v899_v12 = vld [vmem:[%s1170_s3 + $0x18] sm:$0xff]   ;;  %v890_v14 = vld [vmem:[%s1167_s0 + $0x10] sm:$0xff]   ;;  %v892_v16 = vld [vmem:[%s1167_s0 + $0x20] sm:$0xff]   ;;  %s663_s21 = sshll.u32 %s928_s20, 4  ;;  %s664_s21 = int_to_ptr.vmem [resolvable:$true] %s663_s21 }
  0x17   :  { %823 = vmatpush3.bf16.msra.mxu0 %v885_v6  ;;  %v891_v15 = vld [vmem:[%s1167_s0 + $0x18] sm:$0xff]   ;;  %v893_v17 = vld [vmem:[%s1167_s0 + $0x28] sm:$0xff]   ;;  %v894_v18 = vld [vmem:[%s1167_s0 + $0x30] sm:$0xff]   ;;  %s904_s27 = scalar_lea.vmem %s664_s21, 1024  ;;  %p909_p1 = scmp.lt.s32.totalorder %s664_s21, %s664_s21 }
  0x18   :  { %824 = vmatprep.subr.bf16.mxu0 %v886_v9  ;;  %v895_v19 = vld [vmem:[%s1167_s0 + $0x38] sm:$0xff]   ;;  %v900_v20 = vld [vmem:[%s1170_s3 + $0x20] sm:$0xff]   ;;  %v901_v21 = vld [vmem:[%s1170_s3 + $0x28] sm:$0xff]   ;;  %p905_p0 = scmp.ne.s32.totalorder %s664_s21, %s904_s27  ;;  %p910_p2 = scmp.lt.s32.totalorder %s904_s27, %s904_s27 }
  0x19   :  { %849 = vmatpush3.bf16.msra.mxu1 %v898_v10  ;;  %v902_v22 = vld [vmem:[%s1170_s3 + $0x30] sm:$0xff]   ;;  %v903_v23 = vld [vmem:[%s1170_s3 + $0x38] sm:$0xff]   ;;  %v1041_v48 = vld [vmem:[%s1171_s4] ss:$0 sm:$0xff] }
  0x1a   :  { %850 = vmatprep.subr.bf16.mxu1 %v899_v12  ;;  %v530_v52 = vld [vmem:[%s1169_s2 + $0x10] sm:$0xff]  ;;  %v528_v56 = vld [vmem:[%s1169_s2] sm:$0xff]  ;;  %v531_v60 = vld [vmem:[%s1169_s2 + $0x18] sm:$0xff]  ;;  %p911_p3 = por %p910_p2, %p909_p1 }
  0x1b   :  { %825 = vmatpush3.bf16.msra.mxu0 %v886_v9  ;;  %v529_v0 = vld [vmem:[%s1169_s2 + $0x8] sm:$0xff]  ;;  %v534_v10 = vld [vmem:[%s1169_s2 + $0x30] sm:$0xff] }
  0x1c   :  { %826 = vmatprep.subr.bf16.mxu0 %v887_v11  ;;  %p912_p4 = pnand %p911_p3, %p905_p0 }
  0x1d   :  { %851 = vmatpush3.bf16.msra.mxu1 %v899_v12 }
  0x1e   :  { %852 = vmatprep.subr.bf16.mxu1 %v900_v20 }
  0x1f   :  { %827 = vmatpush3.bf16.msra.mxu0 %v887_v11 }
  0x21   :  { %853 = vmatpush3.bf16.msra.mxu1 %v900_v20 }
  0x22   :  { %829 = vmatmul.mubr.bf16.vlgmr.msra.gmra.mrb[0].mxu0 %v889_v13  ;;  %854 = vmatprep.subr.bf16.mxu1 %v901_v21 }
  0x23   :  { %832 = vmatprep.mubr.bf16.mxu0 %v890_v14  ;;  %v532_v14 = vld [vmem:[%s1169_s2 + $0x20] sm:$0xff] }
  0x25   :  { %855 = vmatpush3.bf16.msra.mxu1 %v901_v21 }
  0x26   :  { %856 = vmatprep.subr.bf16.mxu1 %v902_v22 }
  0x29   :  { %857 = vmatpush3.bf16.msra.mxu1 %v902_v22  ;;  %v533_v22 = vld [vmem:[%s1169_s2 + $0x28] sm:$0xff] }
  0x2a   :  { %833 = vmatmul.mubr.bf16.gmra.mrb[4].mxu0 %v891_v15  ;;  %858 = vmatprep.subr.bf16.mxu1 %v903_v23 }
  0x2b   :  { %836 = vmatprep.mubr.bf16.mxu0 %v892_v16 }
  0x2d   :  { %859 = vmatpush3.bf16.msra.mxu1 %v903_v23 }
  0x32   :  { %837 = vmatmul.mubr.bf16.gmra.mrb[8].mxu0 %v893_v17 }
  0x33   :  { %840 = vmatprep.mubr.bf16.mxu0 %v894_v18  ;;  %v535_v18 = vld [vmem:[%s1169_s2 + $0x38] sm:$0xff] }
  0x3a   :  { %841 = vmatmul.mubr.bf16.gmra.mrb[12].mxu0 %v895_v19 }
  0xf5   :  { %v830_v24 = vpop.f32.mrb[0].mxu0 }
  0xf6   :  { %v222_v25 = vpop.f32.mrb[1].mxu0 }
  0xf7   :  { %v831_v26 = vpop.f32.mrb[2].mxu0 }
  0xf8   :  { %v225_v27 = vpop.f32.mrb[3].mxu0  ;;  %v337_v28 = vpack.c.bf16 %v831_v26, %v830_v24 }
  0xf9   :  { %v336_v29 = vpack.c.bf16 %v225_v27, %v222_v25 }
  0xfb   :  { %860 = vmatprep.mubr.bf16.mxu1 %v336_v29 }
  0xfc   :  { %861 = vmatmul.mubr.bf16.vlgmr.msra.gmra.mrb[0].mxu1 %v337_v28 }
  0xfd   :  { %v834_v30 = vpop.f32.mrb[4].mxu0 }
  0xfe   :  { %v238_v31 = vpop.f32.mrb[5].mxu0 }
  0xff   :  { %v835_v32 = vpop.f32.mrb[6].mxu0 }
 0x100   :  { %v241_v33 = vpop.f32.mrb[7].mxu0  ;;  %v339_v34 = vpack.c.bf16 %v835_v32, %v834_v30  ;;  %v538_v32 = vld [vmem:[%s1169_s2 + $0x50] sm:$0xff] }
 0x101   :  { %v338_v35 = vpack.c.bf16 %v241_v33, %v238_v31 }
 0x103   :  { %864 = vmatprep.mubr.bf16.mxu1 %v338_v35 }
 0x104   :  { %865 = vmatmul.mubr.bf16.gmra.mrb[4].mxu1 %v339_v34 }
 0x105   :  { %v838_v36 = vpop.f32.mrb[8].mxu0 }
 0x106   :  { %v254_v37 = vpop.f32.mrb[9].mxu0 }
 0x107   :  { %v839_v38 = vpop.f32.mrb[10].mxu0 }
 0x108   :  { %v257_v39 = vpop.f32.mrb[11].mxu0  ;;  %v341_v40 = vpack.c.bf16 %v839_v38, %v838_v36  ;;  %v536_v36 = vld [vmem:[%s1169_s2 + $0x40] sm:$0xff] }
 0x109   :  { %v340_v41 = vpack.c.bf16 %v257_v39, %v254_v37 }
 0x10b   :  { %868 = vmatprep.mubr.bf16.mxu1 %v340_v41 }
 0x10c   :  { %869 = vmatmul.mubr.bf16.gmra.mrb[8].mxu1 %v341_v40  ;;  %v539_v40 = vld [vmem:[%s1169_s2 + $0x58] sm:$0xff] }
 0x10d   :  { %v842_v42 = vpop.f32.mrb[12].mxu0 }
 0x10e   :  { %v270_v43 = vpop.f32.mrb[13].mxu0 }
 0x10f   :  { %v843_v44 = vpop.f32.mrb[14].mxu0 }
 0x110   :  { %v273_v45 = vpop.f32.mrb[15].mxu0  ;;  %v343_v46 = vpack.c.bf16 %v843_v44, %v842_v42  ;;  %v537_v44 = vld [vmem:[%s1169_s2 + $0x48] sm:$0xff] }
 0x111   :  { %v342_v47 = vpack.c.bf16 %v273_v45, %v270_v43 }
 0x113   :  { %872 = vmatprep.mubr.bf16.mxu1 %v342_v47 }
 0x114   :  { %873 = vmatmul.mubr.bf16.gmra.mrb[12].mxu1 %v343_v46 }
 0x1cf   :  { %v862_v49 = vpop.f32.mrb[0].mxu1 }
 0x1d0   :  { %v458_v50 = vadd.f32 %v862_v49, %v1041_v48  ;;  %v449_v51 = vpop.f32.mrb[1].mxu1 }
 0x1d1   :  { %v450_v53 = vadd.f32 %v1041_v48, %v449_v51  ;;  %v863_v54 = vpop.f32.mrb[2].mxu1 }
 0x1d2   :  { %v514_v55 = vmax.f32 %v458_v50, 0.0  ;;  %v461_v57 = vadd.f32 %v863_v54, %v1041_v48  ;;  %v452_v58 = vpop.f32.mrb[3].mxu1 }
 0x1d3   :  { %v512_v59 = vmax.f32 %v450_v53, 0.0  ;;  %v453_v61 = vadd.f32 %v1041_v48, %v452_v58 }
 0x1d4   :  { %v546_v62 = vadd.f32 %v530_v52, %v514_v55  ;;  %v515_v63 = vmax.f32 %v461_v57, 0.0  ;;  %v542_v55 = vld [vmem:[%s1169_s2 + $0x70] sm:$0xff] }
 0x1d5   :  { %v544_v1 = vadd.f32 %v528_v56, %v512_v59  ;;  %v513_v2 = vmax.f32 %v453_v61, 0.0  ;;  %v540_v59 = vld [vmem:[%s1169_s2 + $0x60] sm:$0xff] }
 0x1d6   :  { %562 = vst [vmem:[%s1172_s5 + $0x10] sm:$0xff] %v546_v62  ;;  %v547_v3 = vadd.f32 %v531_v60, %v515_v63  ;;  %v543_v63 = vld [vmem:[%s1169_s2 + $0x78] sm:$0xff] }
 0x1d7   :  { %560 = vst [vmem:[%s1172_s5] sm:$0xff] %v544_v1  ;;  %v545_v4 = vadd.f32 %v529_v0, %v513_v2  ;;  %v866_v5 = vpop.f32.mrb[4].mxu1 }
 0x1d8   :  { %563 = vst [vmem:[%s1172_s5 + $0x18] sm:$0xff] %v547_v3  ;;  %v741_v6 = vpack.c.bf16 %v547_v3, %v546_v62  ;;  %v474_v7 = vadd.f32 %v866_v5, %v1041_v48  ;;  %v465_v8 = vpop.f32.mrb[5].mxu1  ;;  %v541_v3 = vld [vmem:[%s1169_s2 + $0x68] sm:$0xff] }
 0x1d9   :  { %561 = vst [vmem:[%s1172_s5 + $0x8] sm:$0xff] %v545_v4  ;;  %v736_v9 = vpack.c.bf16 %v545_v4, %v544_v1  ;;  %v466_v11 = vadd.f32 %v1041_v48, %v465_v8  ;;  %v867_v12 = vpop.f32.mrb[6].mxu1 }
 0x1da   :  { %773 = vst [vmem:[#allocation2 + $0x8] sm:$0xff] %v741_v6   ;;  %v518_v13 = vmax.f32 %v474_v7, 0.0  ;;  %v477_v15 = vadd.f32 %v867_v12, %v1041_v48  ;;  %v468_v16 = vpop.f32.mrb[7].mxu1 }
 0x1db   :  { %737 = vst [vmem:[#allocation2] sm:$0xff] %v736_v9   ;;  %v516_v17 = vmax.f32 %v466_v11, 0.0  ;;  %v469_v19 = vadd.f32 %v1041_v48, %v468_v16 }
 0x1dc   :  { %v550_v20 = vadd.f32 %v534_v10, %v518_v13  ;;  %v519_v21 = vmax.f32 %v477_v15, 0.0 }
 0x1dd   :  { %v548_v23 = vadd.f32 %v532_v14, %v516_v17  ;;  %v517_v24 = vmax.f32 %v469_v19, 0.0 }
 0x1de   :  { %566 = vst [vmem:[%s1172_s5 + $0x30] sm:$0xff] %v550_v20  ;;  %v551_v25 = vadd.f32 %v535_v18, %v519_v21 }
 0x1df   :  { %564 = vst [vmem:[%s1172_s5 + $0x20] sm:$0xff] %v548_v23  ;;  %v549_v26 = vadd.f32 %v533_v22, %v517_v24  ;;  %v870_v27 = vpop.f32.mrb[8].mxu1 }
 0x1e0   :  { %567 = vst [vmem:[%s1172_s5 + $0x38] sm:$0xff] %v551_v25  ;;  %v751_v28 = vpack.c.bf16 %v551_v25, %v550_v20  ;;  %v490_v29 = vadd.f32 %v870_v27, %v1041_v48  ;;  %v481_v30 = vpop.f32.mrb[9].mxu1 }
 0x1e1   :  { %565 = vst [vmem:[%s1172_s5 + $0x28] sm:$0xff] %v549_v26  ;;  %v746_v31 = vpack.c.bf16 %v549_v26, %v548_v23  ;;  %v482_v33 = vadd.f32 %v1041_v48, %v481_v30  ;;  %v871_v34 = vpop.f32.mrb[10].mxu1 }
 0x1e2   :  { %775 = vst [vmem:[#allocation2 + $0x18] sm:$0xff] %v751_v28   ;;  %v522_v35 = vmax.f32 %v490_v29, 0.0  ;;  %v493_v37 = vadd.f32 %v871_v34, %v1041_v48  ;;  %v484_v38 = vpop.f32.mrb[11].mxu1 }
 0x1e3   :  { %774 = vst [vmem:[#allocation2 + $0x10] sm:$0xff] %v746_v31   ;;  %v520_v39 = vmax.f32 %v482_v33, 0.0  ;;  %v485_v41 = vadd.f32 %v1041_v48, %v484_v38 }
 0x1e4   :  { %v554_v42 = vadd.f32 %v538_v32, %v522_v35  ;;  %v523_v43 = vmax.f32 %v493_v37, 0.0 }
 0x1e5   :  { %v552_v45 = vadd.f32 %v536_v36, %v520_v39  ;;  %v521_v46 = vmax.f32 %v485_v41, 0.0 }
 0x1e6   :  { %570 = vst [vmem:[%s1172_s5 + $0x50] sm:$0xff] %v554_v42  ;;  %v555_v47 = vadd.f32 %v539_v40, %v523_v43 }
 0x1e7   :  { %568 = vst [vmem:[%s1172_s5 + $0x40] sm:$0xff] %v552_v45  ;;  %v553_v49 = vadd.f32 %v537_v44, %v521_v46  ;;  %v874_v50 = vpop.f32.mrb[12].mxu1 }
 0x1e8   :  { %571 = vst [vmem:[%s1172_s5 + $0x58] sm:$0xff] %v555_v47  ;;  %v761_v51 = vpack.c.bf16 %v555_v47, %v554_v42  ;;  %v506_v52 = vadd.f32 %v874_v50, %v1041_v48  ;;  %v497_v53 = vpop.f32.mrb[13].mxu1 }
 0x1e9   :  { %569 = vst [vmem:[%s1172_s5 + $0x48] sm:$0xff] %v553_v49  ;;  %v756_v54 = vpack.c.bf16 %v553_v49, %v552_v45  ;;  %v498_v56 = vadd.f32 %v1041_v48, %v497_v53  ;;  %v875_v57 = vpop.f32.mrb[14].mxu1 }
 0x1ea   :  { %777 = vst [vmem:[#allocation2 + $0x28] sm:$0xff] %v761_v51   ;;  %v526_v58 = vmax.f32 %v506_v52, 0.0  ;;  %v509_v60 = vadd.f32 %v875_v57, %v1041_v48  ;;  %v500_v61 = vpop.f32.mrb[15].mxu1 }
 0x1eb   :  { %776 = vst [vmem:[#allocation2 + $0x20] sm:$0xff] %v756_v54   ;;  %v524_v62 = vmax.f32 %v498_v56, 0.0  ;;  %v501_v0 = vadd.f32 %v1041_v48, %v500_v61 }
 0x1ec   :  { %v558_v1 = vadd.f32 %v542_v55, %v526_v58  ;;  %v527_v2 = vmax.f32 %v509_v60, 0.0 }
 0x1ed   :  { %v556_v4 = vadd.f32 %v540_v59, %v524_v62  ;;  %v525_v5 = vmax.f32 %v501_v0, 0.0 }
 0x1ee   :  { %574 = vst [vmem:[%s1172_s5 + $0x70] sm:$0xff] %v558_v1  ;;  %v559_v6 = vadd.f32 %v543_v63, %v527_v2 }
 0x1ef   :  { %572 = vst [vmem:[%s1172_s5 + $0x60] sm:$0xff] %v556_v4  ;;  %v557_v48 = vadd.f32 %v541_v3, %v525_v5 }
 0x1f0   :  { %575 = vst [vmem:[%s1172_s5 + $0x78] sm:$0xff] %v559_v6  ;;  %v771_v7 = vpack.c.bf16 %v559_v6, %v558_v1 }
 0x1f1   :  { %573 = vst [vmem:[%s1172_s5 + $0x68] sm:$0xff] %v557_v48  ;;  %v766_v8 = vpack.c.bf16 %v557_v48, %v556_v4 }
 0x1f2   :  { %779 = vst [vmem:[#allocation2 + $0x38] sm:$0xff] %v771_v7  }
 0x1f3   :  { %778 = vst [vmem:[#allocation2 + $0x30] sm:$0xff] %v766_v8  }
 0x1f4   :  { %915 = shalt.err (!%p912_p4)
}
 0x1f5   :  { %s916_s30 = scalar_lea.hbm %s1173_s6, 1024 }
 0x1f6   :  { %p917_p5 = scmp.ne.s32.totalorder %s1173_s6, %s916_s30  ;;  %p920_p6 = scmp.lt.u32.totalorder %s916_s30, %s1173_s6 }
 0x1f8   :  { %p922_p7 = pnand %p920_p6, %p917_p5 }
 0x1fa   :  { %925 = shalt.err (!%p922_p7)
}
 0x1fb   :  { %s929_s10 = smov 64   ;;  %s930_s11 = smov 4  }
 0x1fc   :  { %669 = dma.vmem_to_hbm [thread:$0]  %s664_s21, 1024, %s1173_s6, [#allocation3], %s929_s10, %s929_s10, %s930_s11  }
 0x1fd   :  { %926 = dma.done.wait [#allocation3], 1024  }
 0x1fe   :  { %927 = vsyncadd [#allocation3], 4294966272 }
 0x1ff   :  { %675 = vsyncpa [#allocation3], 1 }

</bundles_post_ra>
